<compile_context>
chip_gen: v7x
topology: tpu7x:2x2x1
jax: 0.10.0
libtpu: 0.0.40
codegen_flags: <defaults>
</compile_context>

<pallas_src>
import functools

import jax
import jax.numpy as jnp
import numpy as np
from jax import lax
from jax.experimental import pallas as pl
from jax.experimental.pallas import tpu as pltpu

EPS = 1e-5


# --------------------------------- kernel ------------------------------------

def _middle_layer_kernel(x_ref, wpk_ref, pvec_ref, masks_ref, out_ref, cols_ref,
                         *, N, H, W, offs):
    Cpad, NHW = x_ref.shape
    HW = H * W

    # ---- packed per-channel params: [tproj (N cols) | b1 g1 be1 b2 g2 be2] ----
    pvec = pvec_ref[...]                                    # (Cpad, N + 6)
    tprojT = pvec[:, 0:N]                                   # (Cpad, N)
    b1, g1, be1 = pvec[:, N + 0:N + 1], pvec[:, N + 1:N + 2], pvec[:, N + 2:N + 3]
    b2, g2, be2 = pvec[:, N + 3:N + 4], pvec[:, N + 4:N + 5], pvec[:, N + 5:N + 6]
    wpk = wpk_ref[...]                                      # (2*Cpad, 9*Cpad)
    w1p = wpk[:Cpad, :]
    w2p = wpk[Cpad:, :]

    # ---- x already (Cpad, N*HW); add precomputed per-batch temb bias ----------
    x2d = x_ref[...].astype(jnp.float32)
    tbias = jnp.concatenate(
        [jnp.broadcast_to(tprojT[:, n:n + 1], (Cpad, HW)) for n in range(N)],
        axis=1)                                             # (Cpad, N*HW)
    # residual carries the temb term (PyTorch in-place `x += ...` aliases res)
    xr = x2d + tbias

    def conv3x3(a2d, wp, bias):
        # 9 taps: XLU lane roll + static border mask, streamed into the im2col
        # scratch; one fused MXU dot over K = 9*Cpad.  Wrapped lanes always
        # correspond to out-of-image (ii+dy, jj+dx) and are zeroed by the mask.
        for t, off in enumerate(offs):
            if t == 4:                                      # center tap (dy=dx=0)
                cols_ref[t * Cpad:(t + 1) * Cpad, :] = a2d
            else:
                rolled = pltpu.roll(a2d, (-off) % NHW, 1)
                cols_ref[t * Cpad:(t + 1) * Cpad, :] = rolled * masks_ref[t:t + 1, :]
        return jnp.dot(wp, cols_ref[...], preferred_element_type=jnp.float32) + bias

    def bn_relu(h, gamma, beta):
        # training-mode BatchNorm2d over (N,H,W): biased variance, two-pass
        inv_n = 1.0 / float(NHW)
        mean = jnp.sum(h, axis=1, keepdims=True) * inv_n
        centered = h - mean
        var = jnp.sum(centered * centered, axis=1, keepdims=True) * inv_n
        scale = lax.rsqrt(var + EPS) * gamma
        return jnp.maximum(centered * scale + beta, 0.0)

    h = bn_relu(conv3x3(xr, w1p, b1), g1, be1)
    h = bn_relu(conv3x3(h, w2p, b2), g2, be2)
    out_ref[...] = (h + xr).astype(out_ref.dtype)           # shortcut is None


# --------------------------------- wrapper -----------------------------------

def middle_layer(x_nchw, temb, params):
    N, Cin, H, W = x_nchw.shape
    Cout = params["w1"].shape[0]
    # Shortcut-free path only; with in != out the PyTorch forward itself would
    # fail on `x + res` (shape mismatch), so that branch is unreachable.
    assert Cin == Cout, "MiddleLayer requires in_channels == out_channels"
    C = Cin
    HW = H * W
    NHW = N * HW
    Cpad = ((C + 7) // 8) * 8                # pad channels to the f32 sublane tile

    # activations as (Cpad, N*HW): XLA transpose/pad outside the kernel body
    x2d = x_nchw.transpose(1, 0, 2, 3).reshape(C, NHW)
    x2d = jnp.pad(x2d, ((0, Cpad - C), (0, 0)))

    # temb projection hoisted out of the kernel (tiny GEMV, pure latency inside)
    tproj = temb @ params["fc_w"].T + params["fc_b"]        # (N, C)
    tprojT = jnp.pad(tproj, ((0, 0), (0, Cpad - C))).T      # (Cpad, N)

    def padc(v):
        return jnp.pad(v, (0, Cpad - C))

    # per-channel params packed into a single (Cpad, N+6) slab -> one DMA
    pvec = jnp.concatenate(
        [tprojT,
         jnp.stack([padc(params["b1"]), padc(params["g1"]), padc(params["be1"]),
                    padc(params["b2"]), padc(params["g2"]), padc(params["be2"])],
                   axis=1)],
        axis=1)

    def pack_w(w):
        # (Cout, Cin, 3, 3) -> channel-padded (Cpad, 9*Cpad), tap-major/channel-minor
        wp = jnp.pad(w, ((0, Cpad - w.shape[0]), (0, Cpad - w.shape[1]),
                         (0, 0), (0, 0)))
        return jnp.transpose(wp, (0, 2, 3, 1)).reshape(Cpad, 9 * Cpad)

    wpk = jnp.concatenate([pack_w(params["w1"]), pack_w(params["w2"])], axis=0)

    # static border masks & tap offsets (compile-time numpy, no in-kernel iota)
    ii = np.arange(HW) // W
    jj = np.arange(HW) % W
    offs, mrows = [], []
    for dy in (-1, 0, 1):
        for dx in (-1, 0, 1):
            offs.append(dy * W + dx)
            m = ((ii + dy) >= 0) & ((ii + dy) < H) & ((jj + dx) >= 0) & ((jj + dx) < W)
            mrows.append(np.tile(m.astype(np.float32), N))
    masks = jnp.asarray(np.stack(mrows, axis=0))            # (9, NHW) of {0,1}

    kernel = functools.partial(_middle_layer_kernel, N=N, H=H, W=W, offs=tuple(offs))
    out2d = pl.pallas_call(
        kernel,
        out_shape=jax.ShapeDtypeStruct((Cpad, NHW), x_nchw.dtype),
        in_specs=[pl.BlockSpec(memory_space=pltpu.MemorySpace.VMEM)] * 4,
        out_specs=pl.BlockSpec(memory_space=pltpu.MemorySpace.VMEM),
        scratch_shapes=[pltpu.VMEM((9 * Cpad, NHW), jnp.float32)],   # im2col scratch
        cost_estimate=pl.CostEstimate(
            flops=2 * 2 * Cpad * 9 * Cpad * NHW,
            transcendentals=2 * Cpad,
            bytes_accessed=4 * (2 * Cpad * NHW + 2 * Cpad * 9 * Cpad
                                + Cpad * (N + 6) + 9 * NHW)),
    )(x2d, wpk, pvec, masks)

    # slice off padded channels; free reshape/transpose back to NCHW
    return out2d[:C].reshape(C, N, H, W).transpose(1, 0, 2, 3)


# ----------------------------- pure-JAX reference ----------------------------

def _ref_conv(x, w, b):
    y = lax.conv_general_dilated(x, w, (1, 1), "SAME",
                                 dimension_numbers=("NCHW", "OIHW", "NCHW"))
    return y + b[None, :, None, None]


def _ref_bn(x, g, b):
    m = jnp.mean(x, axis=(0, 2, 3), keepdims=True)
    v = jnp.var(x, axis=(0, 2, 3), keepdims=True)
    return (x - m) * lax.rsqrt(v + EPS) * g[None, :, None, None] + b[None, :, None, None]


def reference(x, temb, p):
    xr = x + (temb @ p["fc_w"].T + p["fc_b"])[:, :, None, None]
    h = jnp.maximum(_ref_bn(_ref_conv(xr, p["w1"], p["b1"]), p["g1"], p["be1"]), 0.0)
    h = jnp.maximum(_ref_bn(_ref_conv(h, p["w2"], p["b2"]), p["g2"], p["be2"]), 0.0)
    return h + xr


# ----------------------------------- main ------------------------------------

if __name__ == "__main__":
    N, C, H, W, T = 2, 4, 16, 16, 16   # in_channels == out_channels == 4, time_emb_dim=16
    ks = jax.random.split(jax.random.PRNGKey(0), 12)
    x = jax.random.normal(ks[0], (N, C, H, W), jnp.float32)
    temb = jax.random.normal(ks[1], (N, T), jnp.float32)
    params = dict(
        fc_w=0.2 * jax.random.normal(ks[2], (C, T), jnp.float32),   # nn.Linear(T, C).weight
        fc_b=0.1 * jax.random.normal(ks[3], (C,), jnp.float32),
        w1=0.2 * jax.random.normal(ks[4], (C, C, 3, 3), jnp.float32),
        b1=0.1 * jax.random.normal(ks[5], (C,), jnp.float32),
        g1=1.0 + 0.1 * jax.random.normal(ks[6], (C,), jnp.float32),
        be1=0.1 * jax.random.normal(ks[7], (C,), jnp.float32),
        w2=0.2 * jax.random.normal(ks[8], (C, C, 3, 3), jnp.float32),
        b2=0.1 * jax.random.normal(ks[9], (C,), jnp.float32),
        g2=1.0 + 0.1 * jax.random.normal(ks[10], (C,), jnp.float32),
        be2=0.1 * jax.random.normal(ks[11], (C,), jnp.float32),
    )

    out = jax.block_until_ready(middle_layer(x, temb, params))
    ref = jax.block_until_ready(reference(x, temb, params))
    np.testing.assert_allclose(np.asarray(out), np.asarray(ref), rtol=5e-2, atol=5e-2)
    print("KERNEL_OK")
</pallas_src>

<mosaic_0001>
module attributes {stable_mosaic.version = 11 : i64} {
  func.func @_middle_layer_kernel(%arg0: memref<8x512xf32, #tpu.memory_space<vmem>>, %arg1: memref<16x72xf32, #tpu.memory_space<vmem>>, %arg2: memref<8x8xf32, #tpu.memory_space<vmem>>, %arg3: memref<9x512xf32, #tpu.memory_space<vmem>>, %arg4: memref<8x512xf32, #tpu.memory_space<vmem>>, %arg5: memref<72x512xf32, #tpu.memory_space<vmem>>) attributes {dimension_semantics = [], scalar_prefetch = 0 : i64, scratch_operands = 1 : i64, tpu.core_type = #tpu.core_type<tc>} {
    %c0 = arith.constant 0 : index
    %c0_0 = arith.constant 0 : index
    %0 = vector.load %arg2[%c0, %c0_0] : memref<8x8xf32, #tpu.memory_space<vmem>>, vector<8x8xf32>
    %1 = vector.extract_strided_slice %0 {offsets = [0, 0], sizes = [8, 2], strides = [1, 1]} : vector<8x8xf32> to vector<8x2xf32>
    %2 = vector.extract_strided_slice %0 {offsets = [0, 2], sizes = [8, 1], strides = [1, 1]} : vector<8x8xf32> to vector<8x1xf32>
    %3 = vector.extract_strided_slice %0 {offsets = [0, 3], sizes = [8, 1], strides = [1, 1]} : vector<8x8xf32> to vector<8x1xf32>
    %4 = vector.extract_strided_slice %0 {offsets = [0, 4], sizes = [8, 1], strides = [1, 1]} : vector<8x8xf32> to vector<8x1xf32>
    %5 = vector.extract_strided_slice %0 {offsets = [0, 5], sizes = [8, 1], strides = [1, 1]} : vector<8x8xf32> to vector<8x1xf32>
    %6 = vector.extract_strided_slice %0 {offsets = [0, 6], sizes = [8, 1], strides = [1, 1]} : vector<8x8xf32> to vector<8x1xf32>
    %7 = vector.extract_strided_slice %0 {offsets = [0, 7], sizes = [8, 1], strides = [1, 1]} : vector<8x8xf32> to vector<8x1xf32>
    %c0_1 = arith.constant 0 : index
    %c0_2 = arith.constant 0 : index
    %8 = vector.load %arg1[%c0_1, %c0_2] : memref<16x72xf32, #tpu.memory_space<vmem>>, vector<16x72xf32>
    %9 = vector.extract_strided_slice %8 {offsets = [0, 0], sizes = [8, 72], strides = [1, 1]} : vector<16x72xf32> to vector<8x72xf32>
    %10 = vector.extract_strided_slice %8 {offsets = [8, 0], sizes = [8, 72], strides = [1, 1]} : vector<16x72xf32> to vector<8x72xf32>
    %c0_3 = arith.constant 0 : index
    %c0_4 = arith.constant 0 : index
    %11 = vector.load %arg0[%c0_3, %c0_4] : memref<8x512xf32, #tpu.memory_space<vmem>>, vector<8x512xf32>
    %12 = vector.extract_strided_slice %1 {offsets = [0, 0], sizes = [8, 1], strides = [1, 1]} : vector<8x2xf32> to vector<8x1xf32>
    %13 = vector.shape_cast %12 : vector<8x1xf32> to vector<8x1xf32>
    %14 = vector.broadcast %13 : vector<8x1xf32> to vector<8x256xf32>
    %15 = vector.extract_strided_slice %1 {offsets = [0, 1], sizes = [8, 1], strides = [1, 1]} : vector<8x2xf32> to vector<8x1xf32>
    %16 = vector.shape_cast %15 : vector<8x1xf32> to vector<8x1xf32>
    %17 = vector.broadcast %16 : vector<8x1xf32> to vector<8x256xf32>
    %18 = tpu.concatenate %14, %17 in 1 : vector<8x256xf32>, vector<8x256xf32> -> vector<8x512xf32>
    %19 = arith.addf %11, %18 : vector<8x512xf32>
    %c17_i32 = arith.constant 17 : i32
    %20 = tpu.dynamic_rotate %19 by %c17_i32 dim 1 : vector<8x512xf32>, i32 -> vector<8x512xf32>
    %c0_5 = arith.constant 0 : index
    %c0_6 = arith.constant 0 : index
    %21 = vector.load %arg3[%c0_5, %c0_6] : memref<9x512xf32, #tpu.memory_space<vmem>>, vector<1x512xf32>
    %22 = vector.broadcast %21 : vector<1x512xf32> to vector<8x512xf32>
    %23 = arith.mulf %20, %22 : vector<8x512xf32>
    %c0_7 = arith.constant 0 : index
    %c0_8 = arith.constant 0 : index
    %24 = vector.load %arg5[%c0_7, %c0_8] : memref<72x512xf32, #tpu.memory_space<vmem>>, vector<8x512xf32>
    tpu.vector_store %arg5[%c0_7, %c0_8], %23 {strides = array<i32>} : memref<72x512xf32, #tpu.memory_space<vmem>>, vector<8x512xf32>,
    %c16_i32 = arith.constant 16 : i32
    %25 = tpu.dynamic_rotate %19 by %c16_i32 dim 1 : vector<8x512xf32>, i32 -> vector<8x512xf32>
    %c1 = arith.constant 1 : index
    %c0_9 = arith.constant 0 : index
    %26 = vector.load %arg3[%c1, %c0_9] : memref<9x512xf32, #tpu.memory_space<vmem>>, vector<1x512xf32>
    %27 = vector.broadcast %26 : vector<1x512xf32> to vector<8x512xf32>
    %28 = arith.mulf %25, %27 : vector<8x512xf32>
    %c8 = arith.constant 8 : index
    %c0_10 = arith.constant 0 : index
    %29 = vector.load %arg5[%c8, %c0_10] : memref<72x512xf32, #tpu.memory_space<vmem>>, vector<8x512xf32>
    tpu.vector_store %arg5[%c8, %c0_10], %28 {strides = array<i32>} : memref<72x512xf32, #tpu.memory_space<vmem>>, vector<8x512xf32>,
    %c15_i32 = arith.constant 15 : i32
    %30 = tpu.dynamic_rotate %19 by %c15_i32 dim 1 : vector<8x512xf32>, i32 -> vector<8x512xf32>
    %c2 = arith.constant 2 : index
    %c0_11 = arith.constant 0 : index
    %31 = vector.load %arg3[%c2, %c0_11] : memref<9x512xf32, #tpu.memory_space<vmem>>, vector<1x512xf32>
    %32 = vector.broadcast %31 : vector<1x512xf32> to vector<8x512xf32>
    %33 = arith.mulf %30, %32 : vector<8x512xf32>
    %c16 = arith.constant 16 : index
    %c0_12 = arith.constant 0 : index
    %34 = vector.load %arg5[%c16, %c0_12] : memref<72x512xf32, #tpu.memory_space<vmem>>, vector<8x512xf32>
    tpu.vector_store %arg5[%c16, %c0_12], %33 {strides = array<i32>} : memref<72x512xf32, #tpu.memory_space<vmem>>, vector<8x512xf32>,
    %c1_i32 = arith.constant 1 : i32
    %35 = tpu.dynamic_rotate %19 by %c1_i32 dim 1 : vector<8x512xf32>, i32 -> vector<8x512xf32>
    %c3 = arith.constant 3 : index
    %c0_13 = arith.constant 0 : index
    %36 = vector.load %arg3[%c3, %c0_13] : memref<9x512xf32, #tpu.memory_space<vmem>>, vector<1x512xf32>
    %37 = vector.broadcast %36 : vector<1x512xf32> to vector<8x512xf32>
    %38 = arith.mulf %35, %37 : vector<8x512xf32>
    %c24 = arith.constant 24 : index
    %c0_14 = arith.constant 0 : index
    %39 = vector.load %arg5[%c24, %c0_14] : memref<72x512xf32, #tpu.memory_space<vmem>>, vector<8x512xf32>
    tpu.vector_store %arg5[%c24, %c0_14], %38 {strides = array<i32>} : memref<72x512xf32, #tpu.memory_space<vmem>>, vector<8x512xf32>,
    %c32 = arith.constant 32 : index
    %c0_15 = arith.constant 0 : index
    %40 = vector.load %arg5[%c32, %c0_15] : memref<72x512xf32, #tpu.memory_space<vmem>>, vector<8x512xf32>
    tpu.vector_store %arg5[%c32, %c0_15], %19 {strides = array<i32>} : memref<72x512xf32, #tpu.memory_space<vmem>>, vector<8x512xf32>,
    %c511_i32 = arith.constant 511 : i32
    %41 = tpu.dynamic_rotate %19 by %c511_i32 dim 1 : vector<8x512xf32>, i32 -> vector<8x512xf32>
    %c5 = arith.constant 5 : index
    %c0_16 = arith.constant 0 : index
    %42 = vector.load %arg3[%c5, %c0_16] : memref<9x512xf32, #tpu.memory_space<vmem>>, vector<1x512xf32>
    %43 = vector.broadcast %42 : vector<1x512xf32> to vector<8x512xf32>
    %44 = arith.mulf %41, %43 : vector<8x512xf32>
    %c40 = arith.constant 40 : index
    %c0_17 = arith.constant 0 : index
    %45 = vector.load %arg5[%c40, %c0_17] : memref<72x512xf32, #tpu.memory_space<vmem>>, vector<8x512xf32>
    tpu.vector_store %arg5[%c40, %c0_17], %44 {strides = array<i32>} : memref<72x512xf32, #tpu.memory_space<vmem>>, vector<8x512xf32>,
    %c497_i32 = arith.constant 497 : i32
    %46 = tpu.dynamic_rotate %19 by %c497_i32 dim 1 : vector<8x512xf32>, i32 -> vector<8x512xf32>
    %c6 = arith.constant 6 : index
    %c0_18 = arith.constant 0 : index
    %47 = vector.load %arg3[%c6, %c0_18] : memref<9x512xf32, #tpu.memory_space<vmem>>, vector<1x512xf32>
    %48 = vector.broadcast %47 : vector<1x512xf32> to vector<8x512xf32>
    %49 = arith.mulf %46, %48 : vector<8x512xf32>
    %c48 = arith.constant 48 : index
    %c0_19 = arith.constant 0 : index
    %50 = vector.load %arg5[%c48, %c0_19] : memref<72x512xf32, #tpu.memory_space<vmem>>, vector<8x512xf32>
    tpu.vector_store %arg5[%c48, %c0_19], %49 {strides = array<i32>} : memref<72x512xf32, #tpu.memory_space<vmem>>, vector<8x512xf32>,
    %c496_i32 = arith.constant 496 : i32
    %51 = tpu.dynamic_rotate %19 by %c496_i32 dim 1 : vector<8x512xf32>, i32 -> vector<8x512xf32>
    %c7 = arith.constant 7 : index
    %c0_20 = arith.constant 0 : index
    %52 = vector.load %arg3[%c7, %c0_20] : memref<9x512xf32, #tpu.memory_space<vmem>>, vector<1x512xf32>
    %53 = vector.broadcast %52 : vector<1x512xf32> to vector<8x512xf32>
    %54 = arith.mulf %51, %53 : vector<8x512xf32>
    %c56 = arith.constant 56 : index
    %c0_21 = arith.constant 0 : index
    %55 = vector.load %arg5[%c56, %c0_21] : memref<72x512xf32, #tpu.memory_space<vmem>>, vector<8x512xf32>
    tpu.vector_store %arg5[%c56, %c0_21], %54 {strides = array<i32>} : memref<72x512xf32, #tpu.memory_space<vmem>>, vector<8x512xf32>,
    %c495_i32 = arith.constant 495 : i32
    %56 = tpu.dynamic_rotate %19 by %c495_i32 dim 1 : vector<8x512xf32>, i32 -> vector<8x512xf32>
    %c8_22 = arith.constant 8 : index
    %c0_23 = arith.constant 0 : index
    %57 = vector.load %arg3[%c8_22, %c0_23] : memref<9x512xf32, #tpu.memory_space<vmem>>, vector<1x512xf32>
    %58 = vector.broadcast %57 : vector<1x512xf32> to vector<8x512xf32>
    %59 = arith.mulf %56, %58 : vector<8x512xf32>
    %c64 = arith.constant 64 : index
    %c0_24 = arith.constant 0 : index
    %60 = vector.load %arg5[%c64, %c0_24] : memref<72x512xf32, #tpu.memory_space<vmem>>, vector<8x512xf32>
    tpu.vector_store %arg5[%c64, %c0_24], %59 {strides = array<i32>} : memref<72x512xf32, #tpu.memory_space<vmem>>, vector<8x512xf32>,
    %c0_25 = arith.constant 0 : index
    %c0_26 = arith.constant 0 : index
    %61 = vector.load %arg5[%c0_25, %c0_26] : memref<72x512xf32, #tpu.memory_space<vmem>>, vector<72x512xf32>
    %cst = arith.constant dense<0.000000e+00> : vector<8x512xf32>
    %62 = tpu.matmul %9, %61, %cst {dimension_numbers = #tpu.dot_dimension_numbers<[1], [0], [0], [1], [0, 0, 1, 1], [], []>} : vector<8x72xf32>, vector<72x512xf32>, vector<8x512xf32> -> vector<8x512xf32>
    %63 = vector.broadcast %2 : vector<8x1xf32> to vector<8x512xf32>
    %64 = arith.addf %62, %63 : vector<8x512xf32>
    %cst_27 = arith.constant dense<0.000000e+00> : vector<8xf32>
    %65 = vector.multi_reduction <add>, %64, %cst_27 [1] : vector<8x512xf32> to vector<8xf32>
    %66 = vector.shape_cast %65 : vector<8xf32> to vector<8x1xf32>
    %cst_28 = arith.constant 0.001953125 : f32
    %67 = vector.broadcast %cst_28 : f32 to vector<8x1xf32>
    %68 = arith.mulf %66, %67 : vector<8x1xf32>
    %69 = vector.broadcast %68 : vector<8x1xf32> to vector<8x512xf32>
    %70 = arith.subf %64, %69 : vector<8x512xf32>
    %71 = arith.mulf %70, %70 : vector<8x512xf32>
    %cst_29 = arith.constant dense<0.000000e+00> : vector<8xf32>
    %72 = vector.multi_reduction <add>, %71, %cst_29 [1] : vector<8x512xf32> to vector<8xf32>
    %73 = vector.shape_cast %72 : vector<8xf32> to vector<8x1xf32>
    %cst_30 = arith.constant 0.001953125 : f32
    %74 = vector.broadcast %cst_30 : f32 to vector<8x1xf32>
    %75 = arith.mulf %73, %74 : vector<8x1xf32>
    %cst_31 = arith.constant 9.99999974E-6 : f32
    %76 = vector.broadcast %cst_31 : f32 to vector<8x1xf32>
    %77 = arith.addf %75, %76 : vector<8x1xf32>
    %78 = math.rsqrt %77 : vector<8x1xf32>
    %79 = arith.mulf %78, %3 : vector<8x1xf32>
    %80 = vector.broadcast %79 : vector<8x1xf32> to vector<8x512xf32>
    %81 = arith.mulf %70, %80 : vector<8x512xf32>
    %82 = vector.broadcast %4 : vector<8x1xf32> to vector<8x512xf32>
    %83 = arith.addf %81, %82 : vector<8x512xf32>
    %cst_32 = arith.constant 0.000000e+00 : f32
    %84 = vector.broadcast %cst_32 : f32 to vector<8x512xf32>
    %85 = arith.maximumf %83, %84 : vector<8x512xf32>
    %c17_i32_33 = arith.constant 17 : i32
    %86 = tpu.dynamic_rotate %85 by %c17_i32_33 dim 1 : vector<8x512xf32>, i32 -> vector<8x512xf32>
    %c0_34 = arith.constant 0 : index
    %c0_35 = arith.constant 0 : index
    %87 = vector.load %arg3[%c0_34, %c0_35] : memref<9x512xf32, #tpu.memory_space<vmem>>, vector<1x512xf32>
    %88 = vector.broadcast %87 : vector<1x512xf32> to vector<8x512xf32>
    %89 = arith.mulf %86, %88 : vector<8x512xf32>
    %c0_36 = arith.constant 0 : index
    %c0_37 = arith.constant 0 : index
    %90 = vector.load %arg5[%c0_36, %c0_37] : memref<72x512xf32, #tpu.memory_space<vmem>>, vector<8x512xf32>
    tpu.vector_store %arg5[%c0_36, %c0_37], %89 {strides = array<i32>} : memref<72x512xf32, #tpu.memory_space<vmem>>, vector<8x512xf32>,
    %c16_i32_38 = arith.constant 16 : i32
    %91 = tpu.dynamic_rotate %85 by %c16_i32_38 dim 1 : vector<8x512xf32>, i32 -> vector<8x512xf32>
    %c1_39 = arith.constant 1 : index
    %c0_40 = arith.constant 0 : index
    %92 = vector.load %arg3[%c1_39, %c0_40] : memref<9x512xf32, #tpu.memory_space<vmem>>, vector<1x512xf32>
    %93 = vector.broadcast %92 : vector<1x512xf32> to vector<8x512xf32>
    %94 = arith.mulf %91, %93 : vector<8x512xf32>
    %c8_41 = arith.constant 8 : index
    %c0_42 = arith.constant 0 : index
    %95 = vector.load %arg5[%c8_41, %c0_42] : memref<72x512xf32, #tpu.memory_space<vmem>>, vector<8x512xf32>
    tpu.vector_store %arg5[%c8_41, %c0_42], %94 {strides = array<i32>} : memref<72x512xf32, #tpu.memory_space<vmem>>, vector<8x512xf32>,
    %c15_i32_43 = arith.constant 15 : i32
    %96 = tpu.dynamic_rotate %85 by %c15_i32_43 dim 1 : vector<8x512xf32>, i32 -> vector<8x512xf32>
    %c2_44 = arith.constant 2 : index
    %c0_45 = arith.constant 0 : index
    %97 = vector.load %arg3[%c2_44, %c0_45] : memref<9x512xf32, #tpu.memory_space<vmem>>, vector<1x512xf32>
    %98 = vector.broadcast %97 : vector<1x512xf32> to vector<8x512xf32>
    %99 = arith.mulf %96, %98 : vector<8x512xf32>
    %c16_46 = arith.constant 16 : index
    %c0_47 = arith.constant 0 : index
    %100 = vector.load %arg5[%c16_46, %c0_47] : memref<72x512xf32, #tpu.memory_space<vmem>>, vector<8x512xf32>
    tpu.vector_store %arg5[%c16_46, %c0_47], %99 {strides = array<i32>} : memref<72x512xf32, #tpu.memory_space<vmem>>, vector<8x512xf32>,
    %c1_i32_48 = arith.constant 1 : i32
    %101 = tpu.dynamic_rotate %85 by %c1_i32_48 dim 1 : vector<8x512xf32>, i32 -> vector<8x512xf32>
    %c3_49 = arith.constant 3 : index
    %c0_50 = arith.constant 0 : index
    %102 = vector.load %arg3[%c3_49, %c0_50] : memref<9x512xf32, #tpu.memory_space<vmem>>, vector<1x512xf32>
    %103 = vector.broadcast %102 : vector<1x512xf32> to vector<8x512xf32>
    %104 = arith.mulf %101, %103 : vector<8x512xf32>
    %c24_51 = arith.constant 24 : index
    %c0_52 = arith.constant 0 : index
    %105 = vector.load %arg5[%c24_51, %c0_52] : memref<72x512xf32, #tpu.memory_space<vmem>>, vector<8x512xf32>
    tpu.vector_store %arg5[%c24_51, %c0_52], %104 {strides = array<i32>} : memref<72x512xf32, #tpu.memory_space<vmem>>, vector<8x512xf32>,
    %c32_53 = arith.constant 32 : index
    %c0_54 = arith.constant 0 : index
    %106 = vector.load %arg5[%c32_53, %c0_54] : memref<72x512xf32, #tpu.memory_space<vmem>>, vector<8x512xf32>
    tpu.vector_store %arg5[%c32_53, %c0_54], %85 {strides = array<i32>} : memref<72x512xf32, #tpu.memory_space<vmem>>, vector<8x512xf32>,
    %c511_i32_55 = arith.constant 511 : i32
    %107 = tpu.dynamic_rotate %85 by %c511_i32_55 dim 1 : vector<8x512xf32>, i32 -> vector<8x512xf32>
    %c5_56 = arith.constant 5 : index
    %c0_57 = arith.constant 0 : index
    %108 = vector.load %arg3[%c5_56, %c0_57] : memref<9x512xf32, #tpu.memory_space<vmem>>, vector<1x512xf32>
    %109 = vector.broadcast %108 : vector<1x512xf32> to vector<8x512xf32>
    %110 = arith.mulf %107, %109 : vector<8x512xf32>
    %c40_58 = arith.constant 40 : index
    %c0_59 = arith.constant 0 : index
    %111 = vector.load %arg5[%c40_58, %c0_59] : memref<72x512xf32, #tpu.memory_space<vmem>>, vector<8x512xf32>
    tpu.vector_store %arg5[%c40_58, %c0_59], %110 {strides = array<i32>} : memref<72x512xf32, #tpu.memory_space<vmem>>, vector<8x512xf32>,
    %c497_i32_60 = arith.constant 497 : i32
    %112 = tpu.dynamic_rotate %85 by %c497_i32_60 dim 1 : vector<8x512xf32>, i32 -> vector<8x512xf32>
    %c6_61 = arith.constant 6 : index
    %c0_62 = arith.constant 0 : index
    %113 = vector.load %arg3[%c6_61, %c0_62] : memref<9x512xf32, #tpu.memory_space<vmem>>, vector<1x512xf32>
    %114 = vector.broadcast %113 : vector<1x512xf32> to vector<8x512xf32>
    %115 = arith.mulf %112, %114 : vector<8x512xf32>
    %c48_63 = arith.constant 48 : index
    %c0_64 = arith.constant 0 : index
    %116 = vector.load %arg5[%c48_63, %c0_64] : memref<72x512xf32, #tpu.memory_space<vmem>>, vector<8x512xf32>
    tpu.vector_store %arg5[%c48_63, %c0_64], %115 {strides = array<i32>} : memref<72x512xf32, #tpu.memory_space<vmem>>, vector<8x512xf32>,
    %c496_i32_65 = arith.constant 496 : i32
    %117 = tpu.dynamic_rotate %85 by %c496_i32_65 dim 1 : vector<8x512xf32>, i32 -> vector<8x512xf32>
    %c7_66 = arith.constant 7 : index
    %c0_67 = arith.constant 0 : index
    %118 = vector.load %arg3[%c7_66, %c0_67] : memref<9x512xf32, #tpu.memory_space<vmem>>, vector<1x512xf32>
    %119 = vector.broadcast %118 : vector<1x512xf32> to vector<8x512xf32>
    %120 = arith.mulf %117, %119 : vector<8x512xf32>
    %c56_68 = arith.constant 56 : index
    %c0_69 = arith.constant 0 : index
    %121 = vector.load %arg5[%c56_68, %c0_69] : memref<72x512xf32, #tpu.memory_space<vmem>>, vector<8x512xf32>
    tpu.vector_store %arg5[%c56_68, %c0_69], %120 {strides = array<i32>} : memref<72x512xf32, #tpu.memory_space<vmem>>, vector<8x512xf32>,
    %c495_i32_70 = arith.constant 495 : i32
    %122 = tpu.dynamic_rotate %85 by %c495_i32_70 dim 1 : vector<8x512xf32>, i32 -> vector<8x512xf32>
    %c8_71 = arith.constant 8 : index
    %c0_72 = arith.constant 0 : index
    %123 = vector.load %arg3[%c8_71, %c0_72] : memref<9x512xf32, #tpu.memory_space<vmem>>, vector<1x512xf32>
    %124 = vector.broadcast %123 : vector<1x512xf32> to vector<8x512xf32>
    %125 = arith.mulf %122, %124 : vector<8x512xf32>
    %c64_73 = arith.constant 64 : index
    %c0_74 = arith.constant 0 : index
    %126 = vector.load %arg5[%c64_73, %c0_74] : memref<72x512xf32, #tpu.memory_space<vmem>>, vector<8x512xf32>
    tpu.vector_store %arg5[%c64_73, %c0_74], %125 {strides = array<i32>} : memref<72x512xf32, #tpu.memory_space<vmem>>, vector<8x512xf32>,
    %c0_75 = arith.constant 0 : index
    %c0_76 = arith.constant 0 : index
    %127 = vector.load %arg5[%c0_75, %c0_76] : memref<72x512xf32, #tpu.memory_space<vmem>>, vector<72x512xf32>
    %cst_77 = arith.constant dense<0.000000e+00> : vector<8x512xf32>
    %128 = tpu.matmul %10, %127, %cst_77 {dimension_numbers = #tpu.dot_dimension_numbers<[1], [0], [0], [1], [0, 0, 1, 1], [], []>} : vector<8x72xf32>, vector<72x512xf32>, vector<8x512xf32> -> vector<8x512xf32>
    %129 = vector.broadcast %5 : vector<8x1xf32> to vector<8x512xf32>
    %130 = arith.addf %128, %129 : vector<8x512xf32>
    %cst_78 = arith.constant dense<0.000000e+00> : vector<8xf32>
    %131 = vector.multi_reduction <add>, %130, %cst_78 [1] : vector<8x512xf32> to vector<8xf32>
    %132 = vector.shape_cast %131 : vector<8xf32> to vector<8x1xf32>
    %cst_79 = arith.constant 0.001953125 : f32
    %133 = vector.broadcast %cst_79 : f32 to vector<8x1xf32>
    %134 = arith.mulf %132, %133 : vector<8x1xf32>
    %135 = vector.broadcast %134 : vector<8x1xf32> to vector<8x512xf32>
    %136 = arith.subf %130, %135 : vector<8x512xf32>
    %137 = arith.mulf %136, %136 : vector<8x512xf32>
    %cst_80 = arith.constant dense<0.000000e+00> : vector<8xf32>
    %138 = vector.multi_reduction <add>, %137, %cst_80 [1] : vector<8x512xf32> to vector<8xf32>
    %139 = vector.shape_cast %138 : vector<8xf32> to vector<8x1xf32>
    %cst_81 = arith.constant 0.001953125 : f32
    %140 = vector.broadcast %cst_81 : f32 to vector<8x1xf32>
    %141 = arith.mulf %139, %140 : vector<8x1xf32>
    %cst_82 = arith.constant 9.99999974E-6 : f32
    %142 = vector.broadcast %cst_82 : f32 to vector<8x1xf32>
    %143 = arith.addf %141, %142 : vector<8x1xf32>
    %144 = math.rsqrt %143 : vector<8x1xf32>
    %145 = arith.mulf %144, %6 : vector<8x1xf32>
    %146 = vector.broadcast %145 : vector<8x1xf32> to vector<8x512xf32>
    %147 = arith.mulf %136, %146 : vector<8x512xf32>
    %148 = vector.broadcast %7 : vector<8x1xf32> to vector<8x512xf32>
    %149 = arith.addf %147, %148 : vector<8x512xf32>
    %cst_83 = arith.constant 0.000000e+00 : f32
    %150 = vector.broadcast %cst_83 : f32 to vector<8x512xf32>
    %151 = arith.maximumf %149, %150 : vector<8x512xf32>
    %152 = arith.addf %151, %19 : vector<8x512xf32>
    %c0_84 = arith.constant 0 : index
    %c0_85 = arith.constant 0 : index
    %153 = vector.load %arg4[%c0_84, %c0_85] : memref<8x512xf32, #tpu.memory_space<vmem>>, vector<8x512xf32>
    tpu.vector_store %arg4[%c0_84, %c0_85], %152 {strides = array<i32>} : memref<8x512xf32, #tpu.memory_space<vmem>>, vector<8x512xf32>,
    return
  }
}

</mosaic_0001>

<bundles_post_ra>
// kernel: tpu_custom_call.1
= control target key start
LH: loop header
LB: loop body
LE: loop exit
PB: predicated region body
PF: predicated region fallthrough
CT: control target
= control target key end

     0   :  { %9 = vsyncpa [#allocation4], 0  ;;  %s1992_s0 = inlined_call_operand.hbm [shape: f32[8,512], index: 0, kind: input, shape index: {}]   ;;  %s1993_s1 = inlined_call_operand.hbm [shape: f32[16,72], index: 1, kind: input, shape index: {}]   ;;  %s1994_s2 = inlined_call_operand.hbm [shape: f32[8,8], index: 2, kind: input, shape index: {}]   ;;  %s1995_s3 = inlined_call_operand.hbm [shape: f32[9,512], index: 3, kind: input, shape index: {}]   ;;  %s1996_s4 = inlined_call_operand.hbm [shape: f32[8,512], index: 4, kind: output, shape index: {}]  }
   0x1   :  { %10 = vsyncpa [#allocation7], 0 }
   0x2   :  { %11 = vsyncpa [#allocation10], 0 }
   0x3   :  { %12 = vsyncpa [#allocation5], 0  ;;  %s1495_s15 = smov [#allocation6]   ;;  %s1377_s19 = scalar_lea.hbm %s1993_s1, 256 }
   0x4   :  { %s28_s16 = sshll.u32 %s1495_s15, 4  ;;  %p1378_p0 = scmp.ne.s32.totalorder %s1993_s1, %s1377_s19  ;;  %s29_s16 = int_to_ptr.vmem [resolvable:$true] %s28_s16 }
   0x5   :  { %p1381_p1 = scmp.lt.u32.totalorder %s1377_s19, %s1993_s1 }
   0x7   :  { %p1383_p2 = pnand %p1381_p1, %p1378_p0 }
   0x9   :  { %1386 = shalt.err (!%p1383_p2)
}
   0xa   :  { %s1387_s24 = scalar_lea.vmem %s29_s16, 256  ;;  %p1392_p4 = scmp.lt.s32.totalorder %s29_s16, %s29_s16 }
   0xb   :  { %p1388_p3 = scmp.ne.s32.totalorder %s29_s16, %s1387_s24  ;;  %p1393_p5 = scmp.lt.s32.totalorder %s1387_s24, %s1387_s24 }
   0xd   :  { %p1394_p6 = por %p1393_p5, %p1392_p4 }
   0xf   :  { %p1395_p7 = pnand %p1394_p6, %p1388_p3 }
  0x11   :  { %1398 = shalt.err (!%p1395_p7)
}
  0x12   :  { %s1496_s25 = smov 128   ;;  %s1497_s26 = smov 8  }
  0x13   :  { %34 = dma.hbm_to_vmem [thread:$0]  %s1993_s1, 256, %s29_s16, [#allocation7], %s1496_s25, %s1496_s25, %s1497_s26  }
  0x14   :  { %s1498_s29 = smov [#allocation3]   ;;  %s1499_s5 = smov [#allocation8]  }
  0x15   :  { %s19_s30 = sshll.u32 %s1498_s29, 4  ;;  %s41_s6 = sshll.u32 %s1499_s5, 4  ;;  %s20_s30 = int_to_ptr.vmem [resolvable:$true] %s19_s30  ;;  %s42_s6 = int_to_ptr.vmem [resolvable:$true] %s41_s6 }
  0x16   :  { %s1399_s9 = scalar_lea.hbm %s1992_s0, 512 }
  0x17   :  { %p1400_p8 = scmp.ne.s32.totalorder %s1992_s0, %s1399_s9  ;;  %p1403_p9 = scmp.lt.u32.totalorder %s1399_s9, %s1992_s0 }
  0x19   :  { %p1405_p10 = pnand %p1403_p9, %p1400_p8 }
  0x1b   :  { %1408 = shalt.err (!%p1405_p10)
}
  0x1c   :  { %s1409_s1 = scalar_lea.vmem %s20_s30, 512  ;;  %p1414_p12 = scmp.lt.s32.totalorder %s20_s30, %s20_s30 }
  0x1d   :  { %p1410_p11 = scmp.ne.s32.totalorder %s20_s30, %s1409_s1  ;;  %p1415_p13 = scmp.lt.s32.totalorder %s1409_s1, %s1409_s1 }
  0x1f   :  { %p1416_p0 = por %p1415_p13, %p1414_p12 }
  0x21   :  { %p1417_p1 = pnand %p1416_p0, %p1410_p11 }
  0x23   :  { %1420 = shalt.err (!%p1417_p1)
}
  0x24   :  { %22 = dma.hbm_to_vmem [thread:$0]  %s1992_s0, 512, %s20_s30, [#allocation4]  }
  0x25   :  { %s1421_s18 = scalar_lea.hbm %s1994_s2, 128 }
  0x26   :  { %p1422_p2 = scmp.ne.s32.totalorder %s1994_s2, %s1421_s18  ;;  %p1425_p3 = scmp.lt.u32.totalorder %s1421_s18, %s1994_s2 }
  0x28   :  { %p1427_p4 = pnand %p1425_p3, %p1422_p2 }
  0x2a   :  { %1430 = shalt.err (!%p1427_p4)
}
  0x2b   :  { %s1431_s23 = scalar_lea.vmem %s42_s6, 128  ;;  %p1436_p6 = scmp.lt.s32.totalorder %s42_s6, %s42_s6 }
  0x2c   :  { %p1432_p5 = scmp.ne.s32.totalorder %s42_s6, %s1431_s23  ;;  %p1437_p7 = scmp.lt.s32.totalorder %s1431_s23, %s1431_s23 }
  0x2e   :  { %p1438_p8 = por %p1437_p7, %p1436_p6 }
  0x30   :  { %p1439_p9 = pnand %p1438_p8, %p1432_p5 }
  0x32   :  { %1442 = shalt.err (!%p1439_p9)
}
  0x33   :  { %44 = dma.hbm_to_vmem [thread:$0]  %s1994_s2, 128, %s42_s6, [#allocation7]  }
  0x34   :  { %s1500_s25 = smov [#allocation9]   ;;  %s1443_s29 = scalar_lea.hbm %s1995_s3, 1024 }
  0x35   :  { %s50_s26 = sshll.u32 %s1500_s25, 4  ;;  %p1444_p10 = scmp.ne.s32.totalorder %s1995_s3, %s1443_s29  ;;  %s51_s26 = int_to_ptr.vmem [resolvable:$true] %s50_s26 }
  0x36   :  { %p1447_p11 = scmp.lt.u32.totalorder %s1443_s29, %s1995_s3 }
  0x38   :  { %p1449_p12 = pnand %p1447_p11, %p1444_p10 }
  0x3a   :  { %1452 = shalt.err (!%p1449_p12)
}
  0x3b   :  { %s1453_s9 = scalar_lea.vmem %s51_s26, 1024  ;;  %p1458_p0 = scmp.lt.s32.totalorder %s51_s26, %s51_s26 }
  0x3c   :  { %p1454_p13 = scmp.ne.s32.totalorder %s51_s26, %s1453_s9  ;;  %p1459_p1 = scmp.lt.s32.totalorder %s1453_s9, %s1453_s9 }
  0x3e   :  { %p1460_p2 = por %p1459_p1, %p1458_p0 }
  0x40   :  { %p1461_p3 = pnand %p1460_p2, %p1454_p13 }
  0x42   :  { %1464 = shalt.err (!%p1461_p3)
}
  0x43   :  { %s1501_s2 = smov 512   ;;  %s1502_s6 = smov 32  }
  0x44   :  { %56 = dma.hbm_to_vmem [thread:$0]  %s1995_s3, 1024, %s51_s26, [#allocation10], %s1501_s2, %s1501_s2, %s1502_s6  }
  0x45   :  { %1487 = dma.done.wait [#allocation4], 512  }
  0x46   :  { %1488 = vsyncadd [#allocation4], 4294966784 }
  0x47   :  { %1489 = dma.done.wait [#allocation7], 384  }
  0x48   :  { %1490 = vsyncadd [#allocation7], 4294966912 }
  0x49   :  { %1491 = dma.done.wait [#allocation10], 1024  }
  0x4a   :  { %1492 = vsyncadd [#allocation10], 4294966272  ;;  %v1503_v0 = vmov 0   ;;  %v1594_v1 = vld [vmem:[#allocation8] sm:$0xff]  ;;  %v1504_v2 = vmov 1   ;;  %v72_v3 = vld [vmem:[#allocation3] sm:$0xff]  ;;  %v97_v15 = vlaneseq }
  0x4b   :  { %1364 = vset.pattern.permute.xlu0 %v1503_v0  ;;  %v73_v4 = vld [vmem:[#allocation3 + $0x8] sm:$0xff]  ;;  %s1505_s3 = smov 16   ;;  %s1506_s12 = smov 17   ;;  %v75_v8 = vld [vmem:[#allocation3 + $0x18] sm:$0xff]  ;;  %v74_v9 = vld [vmem:[#allocation3 + $0x10] sm:$0xff]  ;;  %v1513_v13 = vmov 0.0  }
  0x4c   :  { %78 = vperm.xlu0 %1364, %v1594_v1   ;;  %s1507_s13 = smov 15   ;;  %s1508_s1 = smov 1   ;;  %554 = vmatprep.mubr.f32.mxu0 %v1513_v13  ;;  %v1514_v14 = vmov 2   ;;  %v107_v16 = vshrl.u32 %v97_v15, 7  ;;  %v1673_v19 = vand.u32 127, %v97_v15  ;;  %vm486_vm8 = vcmask 588800  }
  0x4d   :  { %s1509_s14 = smov 127   ;;  %s1510_s15 = smov 113   ;;  %625 = vmatprep.mubr.f32.mxu1 %v1513_v13  ;;  %1366 = vset.pattern.permute.xlu1 %v1514_v14  ;;  %v148_v21 = vld [vmem:[#allocation9 + $0x1] ss:$8 sm:$0xf] }
  0x4e   :  { %s1511_s16 = smov 112   ;;  %s1512_s17 = smov 111   ;;  %v1675_v20 = vsub.s32 1, %v107_v16  ;;  %v104_v22 = vld [vmem:[#allocation9] ss:$8 sm:$0xf] }
  0x4f   :  { %vm99_vm0 = vcmp.lt.s32.totalorder %v1673_v19, 17  ;;  %v1678_v25 = vsub.s32 0, %v107_v16  ;;  %vm142_vm1 = vcmp.lt.s32.totalorder %v1673_v19, 16  ;;  %v1685_v30 = vsub.s32 2, %v107_v16  ;;  %s1520_s18 = smov [#allocation11]  }
  0x50   :  { %1365 = vset.pattern.permute.xlu0 %v1504_v2  ;;  %v113_v26 = vrot.slane %v104_v22, %v1675_v20  ;;  %v157_v27 = vrot.slane %v148_v21, %v1675_v20  ;;  %v1687_v31 = vsub.s32 3, %v107_v16  ;;  %v192_v60 = vld [vmem:[#allocation9 + $0x2] ss:$8 sm:$0xf]  ;;  %vm186_vm2 = vcmp.lt.s32.totalorder %v1673_v19, 15  ;;  %s1259_s19 = sshll.u32 %s1520_s18, 4  ;;  %s1260_s19 = int_to_ptr.vmem [resolvable:$true] %s1259_s19 }
  0x51   :  { %82 = vperm.xlu0 %1365, %v1594_v1   ;;  %v153_v34 = vrot.slane %v148_v21, %v1678_v25  ;;  %v109_v35 = vrot.slane %v104_v22, %v1678_v25  ;;  %v161_v41 = vrot.slane %v148_v21, %v1685_v30  ;;  %v117_v47 = vrot.slane %v104_v22, %v1685_v30  ;;  %v236_v61 = vld [vmem:[#allocation9 + $0x3] ss:$8 sm:$0xf]  ;;  %s1465_s20 = scalar_lea.vmem %s1260_s19, 512  ;;  %p1470_p5 = scmp.lt.s32.totalorder %s1260_s19, %s1260_s19 }
  0x52   :  { %v165_v44 = vrot.slane %v148_v21, %v1687_v31  ;;  %v121_v48 = vrot.slane %v104_v22, %v1687_v31  ;;  %vm230_vm3 = vcmp.lt.s32.totalorder %v1673_v19, 1  ;;  %v241_v15 = vrot.slane %v236_v61, %v1678_v25  ;;  %p1466_p4 = scmp.ne.s32.totalorder %s1260_s19, %s1465_s20  ;;  %p1471_p6 = scmp.lt.s32.totalorder %s1465_s20, %s1465_s20 }
  0x53   :  { %vm278_vm4 = vcmp.lt.s32.totalorder %v1673_v19, 127  ;;  %vm322_vm5 = vcmp.lt.s32.totalorder %v1673_v19, 113  ;;  %vm366_vm6 = vcmp.lt.s32.totalorder %v1673_v19, 112  ;;  %vm410_vm7 = vcmp.lt.s32.totalorder %v1673_v19, 111 }
  0x54   :  { %p1472_p7 = por %p1471_p6, %p1470_p5 }
  0x56   :  { %p1473_p8 = pnand %p1472_p7, %p1466_p4 }
  0xcb   :  { %v79_v5 = vpop.permute.xlu0 %78 }
  0xcc   :  { %v1598_v6 = vadd.f32 %v79_v5, %v72_v3  ;;  %v1600_v7 = vadd.f32 %v79_v5, %v73_v4  ;;  %v201_v3 = vrot.slane %v192_v60, %v1675_v20  ;;  %v245_v4 = vrot.slane %v236_v61, %v1675_v20 }
  0xce   :  { %136 = vrot.lane.b32.xlu0 %v1600_v7, %s1505_s3  ;;  %89 = vrot.lane.b32.xlu1 %v1598_v6, %s1506_s12 }
  0xd0   :  { %v83_v10 = vpop.permute.xlu0 %82 }
  0xd1   :  { %v1606_v11 = vadd.f32 %v83_v10, %v75_v8  ;;  %v1610_v12 = vadd.f32 %v83_v10, %v74_v9 }
  0xd2   :  { %91 = vrot.lane.b32.xlu1 %v1600_v7, %s1506_s12 }
  0xd3   :  { %140 = vrot.lane.b32.xlu0 %v1606_v11, %s1505_s3 }
  0xd6   :  { %134 = vrot.lane.b32.xlu1 %v1598_v6, %s1505_s3 }
  0xd7   :  { %138 = vrot.lane.b32.xlu0 %v1610_v12, %s1505_s3 }
  0xda   :  { %95 = vrot.lane.b32.xlu1 %v1606_v11, %s1506_s12 }
  0xdb   :  { %180 = vrot.lane.b32.xlu0 %v1600_v7, %s1507_s13 }
  0xde   :  { %93 = vrot.lane.b32.xlu1 %v1610_v12, %s1506_s12 }
  0xdf   :  { %224 = vrot.lane.b32.xlu0 %v1600_v7, %s1508_s1 }
  0xe2   :  { %178 = vrot.lane.b32.xlu1 %v1598_v6, %s1507_s13 }
  0xe3   :  { %228 = vrot.lane.b32.xlu0 %v1606_v11, %s1508_s1 }
  0xe6   :  { %222 = vrot.lane.b32.xlu1 %v1598_v6, %s1508_s1 }
  0xe7   :  { %226 = vrot.lane.b32.xlu0 %v1610_v12, %s1508_s1 }
  0xea   :  { %184 = vrot.lane.b32.xlu1 %v1606_v11, %s1507_s13 }
  0xeb   :  { %274 = vrot.lane.b32.xlu0 %v1610_v12, %s1509_s14 }
  0xee   :  { %182 = vrot.lane.b32.xlu1 %v1610_v12, %s1507_s13 }
  0xef   :  { %276 = vrot.lane.b32.xlu0 %v1606_v11, %s1509_s14 }
  0xf2   :  { %272 = vrot.lane.b32.xlu1 %v1600_v7, %s1509_s14 }
  0xf3   :  { %318 = vrot.lane.b32.xlu0 %v1610_v12, %s1510_s15 }
  0xf6   :  { %270 = vrot.lane.b32.xlu1 %v1598_v6, %s1509_s14 }
  0xf7   :  { %362 = vrot.lane.b32.xlu0 %v1610_v12, %s1511_s16 }
  0xfa   :  { %316 = vrot.lane.b32.xlu1 %v1600_v7, %s1510_s15 }
  0xfb   :  { %358 = vrot.lane.b32.xlu0 %v1598_v6, %s1511_s16 }
  0xfe   :  { %360 = vrot.lane.b32.xlu1 %v1600_v7, %s1511_s16 }
  0xff   :  { %364 = vrot.lane.b32.xlu0 %v1606_v11, %s1511_s16 }
 0x102   :  { %314 = vrot.lane.b32.xlu1 %v1598_v6, %s1510_s15 }
 0x103   :  { %406 = vrot.lane.b32.xlu0 %v1610_v12, %s1512_s17 }
 0x106   :  { %320 = vrot.lane.b32.xlu1 %v1606_v11, %s1510_s15 }
 0x107   :  { %408 = vrot.lane.b32.xlu0 %v1606_v11, %s1512_s17 }
 0x10a   :  { %404 = vrot.lane.b32.xlu1 %v1600_v7, %s1512_s17 }
 0x10e   :  { %402 = vrot.lane.b32.xlu1 %v1598_v6, %s1512_s17 }
 0x112   :  { %483 = vperm.xlu1 %1366, %v1594_v1  }
 0x140   :  { %v90_v17 = vpop.permute.xlu1 %89  ;;  %v137_v18 = vpop.permute.xlu0 %136 }
 0x144   :  { %v92_v23 = vpop.permute.xlu1 %91 }
 0x145   :  { %v141_v24 = vpop.permute.xlu0 %140  ;;  %v102_v28 = vsel %vm99_vm0, %v90_v17, %v92_v23 }
 0x146   :  { %v127_v36 = vmul.f32 %v113_v26, %v102_v28 }
 0x148   :  { %v135_v29 = vpop.permute.xlu1 %134 }
 0x149   :  { %v145_v32 = vsel %vm142_vm1, %v135_v29, %v137_v18  ;;  %v139_v33 = vpop.permute.xlu0 %138  ;;  %v146_v38 = vsel %vm142_vm1, %v141_v24, %v135_v29 }
 0x14a   :  { %v171_v37 = vmul.f32 %v157_v27, %v145_v32  ;;  %v170_v45 = vmul.f32 %v153_v34, %v146_v38  ;;  %v143_v49 = vsel %vm142_vm1, %v139_v33, %v141_v24  ;;  %v144_v50 = vsel %vm142_vm1, %v137_v18, %v139_v33 }
 0x14b   :  { %v172_v56 = vmul.f32 %v161_v41, %v144_v50  ;;  %v173_v59 = vmul.f32 %v165_v44, %v143_v49  ;;  %v253_v24 = vrot.slane %v236_v61, %v1687_v31  ;;  %v205_v32 = vrot.slane %v192_v60, %v1685_v30 }
 0x14c   :  { %v96_v39 = vpop.permute.xlu1 %95  ;;  %v1274_v40 = vpack.c.bf16 %v171_v37, %v127_v36  ;;  %v209_v33 = vrot.slane %v192_v60, %v1687_v31  ;;  %v284_v37 = vld [vmem:[#allocation9 + $0x5] ss:$8 sm:$0xf] }
 0x14d   :  { %v103_v42 = vsel %vm99_vm0, %v96_v39, %v90_v17  ;;  %v181_v43 = vpop.permute.xlu0 %180  ;;  %v197_v17 = vrot.slane %v192_v60, %v1678_v25 }
 0x14e   :  { %v126_v46 = vmul.f32 %v109_v35, %v103_v42  ;;  %1275 = vmatprep.subr.bf16.mxu0 %v1274_v40  ;;  %v293_v42 = vrot.slane %v284_v37, %v1675_v20 }
 0x150   :  { %v94_v51 = vpop.permute.xlu1 %93  ;;  %v1276_v52 = vpack.c.bf16 %v170_v45, %v126_v46 }
 0x151   :  { %v100_v53 = vsel %vm99_vm0, %v94_v51, %v96_v39  ;;  %v101_v54 = vsel %vm99_vm0, %v92_v23, %v94_v51  ;;  %v225_v55 = vpop.permute.xlu0 %224  ;;  %v249_v23 = vrot.slane %v236_v61, %v1685_v30  ;;  %v297_v51 = vrot.slane %v284_v37, %v1685_v30 }
 0x152   :  { %v128_v57 = vmul.f32 %v117_v47, %v101_v54  ;;  %1277 = vmatpush1.bf16.msra.mxu0 %v1276_v52  ;;  %v129_v58 = vmul.f32 %v121_v48, %v100_v53 }
 0x154   :  { %v179_v62 = vpop.permute.xlu1 %178  ;;  %v1290_v63 = vpack.c.bf16 %v173_v59, %v129_v58  ;;  %v1292_v0 = vpack.c.bf16 %v172_v56, %v128_v57  ;;  %v301_v56 = vrot.slane %v284_v37, %v1687_v31 }
 0x155   :  { %v229_v2 = vpop.permute.xlu0 %228  ;;  %v189_v5 = vsel %vm186_vm2, %v179_v62, %v181_v43 }
 0x156   :  { %1291 = vmatprep.subr.bf16.mxu1 %v1290_v63  ;;  %v215_v14 = vmul.f32 %v201_v3, %v189_v5  ;;  %v372_v3 = vld [vmem:[#allocation9 + $0x7] ss:$8 sm:$0xf] }
 0x157   :  { %1293 = vmatpush1.bf16.msra.mxu1 %v1292_v0 }
 0x158   :  { %v223_v8 = vpop.permute.xlu1 %222 }
 0x159   :  { %v233_v9 = vsel %vm230_vm3, %v223_v8, %v225_v55  ;;  %v227_v10 = vpop.permute.xlu0 %226  ;;  %v234_v18 = vsel %vm230_vm3, %v229_v2, %v223_v8 }
 0x15a   :  { %v259_v16 = vmul.f32 %v245_v4, %v233_v9  ;;  %v258_v28 = vmul.f32 %v241_v15, %v234_v18  ;;  %v231_v34 = vsel %vm230_vm3, %v227_v10, %v229_v2  ;;  %v232_v35 = vsel %vm230_vm3, %v225_v55, %v227_v10  ;;  %v328_v2 = vld [vmem:[#allocation9 + $0x6] ss:$8 sm:$0xf] }
 0x15b   :  { %v260_v44 = vmul.f32 %v249_v23, %v232_v35  ;;  %v261_v45 = vmul.f32 %v253_v24, %v231_v34  ;;  %v289_v55 = vrot.slane %v284_v37, %v1678_v25  ;;  %v381_v15 = vrot.slane %v372_v3, %v1675_v20 }
 0x15c   :  { %v185_v21 = vpop.permute.xlu1 %184  ;;  %v1278_v22 = vpack.c.bf16 %v259_v16, %v215_v14  ;;  %v337_v14 = vrot.slane %v328_v2, %v1675_v20  ;;  %v377_v23 = vrot.slane %v372_v3, %v1678_v25  ;;  %v341_v37 = vrot.slane %v328_v2, %v1685_v30 }
 0x15d   :  { %v190_v26 = vsel %vm186_vm2, %v185_v21, %v179_v62  ;;  %v275_v27 = vpop.permute.xlu0 %274 }
 0x15e   :  { %v214_v29 = vmul.f32 %v197_v17, %v190_v26  ;;  %1279 = vmatprep.subr.bf16.mxu0 %v1278_v22  ;;  %v333_v26 = vrot.slane %v328_v2, %v1678_v25 }
 0x160   :  { %v183_v36 = vpop.permute.xlu1 %182  ;;  %v1280_v38 = vpack.c.bf16 %v258_v28, %v214_v29 }
 0x161   :  { %v187_v39 = vsel %vm186_vm2, %v183_v36, %v185_v21  ;;  %v188_v40 = vsel %vm186_vm2, %v181_v43, %v183_v36  ;;  %v277_v41 = vpop.permute.xlu0 %276 }
 0x162   :  { %v216_v46 = vmul.f32 %v205_v32, %v188_v40  ;;  %v217_v47 = vmul.f32 %v209_v33, %v187_v39  ;;  %1281 = vmatpush1.bf16.msra.mxu0 %v1280_v38  ;;  %v279_v43 = vsel %vm278_vm4, %v275_v27, %v277_v41  ;;  %v385_v32 = vrot.slane %v372_v3, %v1685_v30 }
 0x163   :  { %v308_v59 = vmul.f32 %v297_v51, %v279_v43  ;;  %v389_v33 = vrot.slane %v372_v3, %v1687_v31  ;;  %v345_v38 = vrot.slane %v328_v2, %v1687_v31 }
 0x164   :  { %v273_v48 = vpop.permute.xlu1 %272  ;;  %v1294_v49 = vpack.c.bf16 %v261_v45, %v217_v47  ;;  %v1296_v50 = vpack.c.bf16 %v260_v44, %v216_v46  ;;  %v416_v44 = vld [vmem:[#allocation9 + $0x20] ss:$8 sm:$0xf] }
 0x165   :  { %v280_v52 = vsel %vm278_vm4, %v273_v48, %v275_v27  ;;  %v319_v53 = vpop.permute.xlu0 %318  ;;  %v1300_v10 = vpack.c.bf16 %v308_v59, %v1610_v12  ;;  %v433_v59 = vrot.slane %v416_v44, %v1687_v31 }
 0x166   :  { %v307_v54 = vmul.f32 %v293_v42, %v280_v52  ;;  %1295 = vmatprep.subr.bf16.mxu1 %v1294_v49 }
 0x167   :  { %1297 = vmatpush1.bf16.msra.mxu1 %v1296_v50 }
 0x168   :  { %v271_v57 = vpop.permute.xlu1 %270  ;;  %v1282_v58 = vpack.c.bf16 %v307_v54, %v1600_v7 }
 0x169   :  { %v281_v60 = vsel %vm278_vm4, %v271_v57, %v273_v48  ;;  %v282_v61 = vsel %vm278_vm4, %v277_v41, %v271_v57  ;;  %v363_v62 = vpop.permute.xlu0 %362  ;;  %v425_v48 = vrot.slane %v416_v44, %v1675_v20 }
 0x16a   :  { %v306_v63 = vmul.f32 %v289_v55, %v281_v60  ;;  %v309_v0 = vmul.f32 %v301_v56, %v282_v61  ;;  %1283 = vmatprep.subr.bf16.mxu0 %v1282_v58  ;;  %v421_v58 = vrot.slane %v416_v44, %v1678_v25  ;;  %v429_v60 = vrot.slane %v416_v44, %v1685_v30 }
 0x16c   :  { %v317_v4 = vpop.permute.xlu1 %316  ;;  %v1284_v5 = vpack.c.bf16 %v306_v63, %v1598_v6  ;;  %v1298_v8 = vpack.c.bf16 %v309_v0, %v1606_v11 }
 0x16d   :  { %v359_v9 = vpop.permute.xlu0 %358  ;;  %v324_v16 = vsel %vm322_vm5, %v317_v4, %v319_v53 }
 0x16e   :  { %1285 = vmatpush1.bf16.msra.mxu0 %v1284_v5  ;;  %1299 = vmatprep.subr.bf16.mxu1 %v1298_v8  ;;  %v351_v22 = vmul.f32 %v337_v14, %v324_v16 }
 0x16f   :  { %1301 = vmatpush1.bf16.msra.mxu1 %v1300_v10 }
 0x170   :  { %v361_v17 = vpop.permute.xlu1 %360 }
 0x171   :  { %v368_v18 = vsel %vm366_vm6, %v361_v17, %v363_v62  ;;  %v365_v21 = vpop.permute.xlu0 %364  ;;  %v369_v27 = vsel %vm366_vm6, %v359_v9, %v361_v17 }
 0x172   :  { %v395_v24 = vmul.f32 %v381_v15, %v368_v18  ;;  %v394_v35 = vmul.f32 %v377_v23, %v369_v27  ;;  %v367_v39 = vsel %vm366_vm6, %v363_v62, %v365_v21  ;;  %v370_v40 = vsel %vm366_vm6, %v365_v21, %v359_v9 }
 0x173   :  { %v396_v49 = vmul.f32 %v385_v32, %v367_v39  ;;  %v397_v50 = vmul.f32 %v389_v33, %v370_v40  ;;  %v1515_v40 = vmov 3  }
 0x174   :  { %v315_v28 = vpop.permute.xlu1 %314  ;;  %v1286_v29 = vpack.c.bf16 %v395_v24, %v351_v22  ;;  %1367 = vset.pattern.permute.xlu0 %v1515_v40 }
 0x175   :  { %v325_v34 = vsel %vm322_vm5, %v315_v28, %v317_v4  ;;  %v407_v41 = vpop.permute.xlu0 %406  ;;  %v70_v4 = vld [vmem:[#allocation6] sm:$0xff] }
 0x176   :  { %v350_v36 = vmul.f32 %v333_v26, %v325_v34  ;;  %1287 = vmatprep.subr.bf16.mxu0 %v1286_v29 }
 0x178   :  { %v321_v42 = vpop.permute.xlu1 %320  ;;  %v1288_v45 = vpack.c.bf16 %v394_v35, %v350_v36 }
 0x179   :  { %v323_v46 = vsel %vm322_vm5, %v319_v53, %v321_v42  ;;  %v326_v47 = vsel %vm322_vm5, %v321_v42, %v315_v28  ;;  %v409_v56 = vpop.permute.xlu0 %408 }
 0x17a   :  { %v352_v51 = vmul.f32 %v341_v37, %v323_v46  ;;  %v353_v52 = vmul.f32 %v345_v38, %v326_v47  ;;  %1289 = vmatpush1.bf16.msra.mxu0 %v1288_v45  ;;  %v411_v61 = vsel %vm410_vm7, %v407_v41, %v409_v56 }
 0x17b   :  { %v440_v5 = vmul.f32 %v429_v60, %v411_v61  ;;  %v1517_v61 = vmov 5  }
 0x17c   :  { %v405_v43 = vpop.permute.xlu1 %404  ;;  %v1302_v54 = vpack.c.bf16 %v397_v50, %v353_v52  ;;  %v1304_v55 = vpack.c.bf16 %v396_v49, %v352_v51 }
 0x17d   :  { %v412_v57 = vsel %vm410_vm7, %v405_v43, %v407_v41  ;;  %v1516_v41 = vmov 4  }
 0x17e   :  { %v439_v53 = vmul.f32 %v425_v48, %v412_v57  ;;  %1303 = vmatprep.subr.bf16.mxu1 %v1302_v54  ;;  %1368 = vset.pattern.permute.xlu1 %v1516_v41 }
 0x17f   :  { %1305 = vmatpush1.bf16.msra.mxu1 %v1304_v55 }
 0x180   :  { %v403_v62 = vpop.permute.xlu1 %402  ;;  %506 = vmatprep.subr.mxu0 %v439_v53 }
 0x181   :  { %v413_v63 = vsel %vm410_vm7, %v403_v62, %v405_v43  ;;  %v414_v0 = vsel %vm410_vm7, %v409_v56, %v403_v62 }
 0x182   :  { %v438_v2 = vmul.f32 %v421_v58, %v413_v63  ;;  %v441_v3 = vmul.f32 %v433_v59, %v414_v0 }
 0x184   :  { %507 = vmatpush1.msra.mxu0 %v438_v2  ;;  %577 = vmatprep.subr.mxu1 %v441_v3  ;;  %v688_v3 = vld [vmem:[#allocation9] ss:$8 sm:$0xf] }
 0x185   :  { %1270 = vmatmul.mubr.msk.f32.vlgmr.msra.gmra.mrb[0].mxu0 %vm486_vm8, %v70_v4  ;;  %578 = vmatpush1.msra.mxu1 %v440_v5 }
 0x186   :  { %1271 = vmatmul.mubr.msk.f32.vlgmr.msra.gmra.mrb[0].mxu1 %vm486_vm8, %v70_v4  ;;  %1123 = vmatprep.mubr.f32.mxu0 %v1513_v13  ;;  %v730_v4 = vld [vmem:[#allocation9 + $0x1] ss:$8 sm:$0xf] }
 0x187   :  { %1194 = vmatprep.mubr.f32.mxu1 %v1513_v13 }
 0x191   :  { %v484_v8 = vpop.permute.xlu1 %483 }
 0x258   :  { %v556_v9 = vpop.f32.mrb[0].mxu0 }
 0x259   :  { %v557_v10 = vadd.f32 %v556_v9, %v484_v8  ;;  %v558_v14 = vpop.f32.mrb[1].mxu0  ;;  %v627_v15 = vpop.f32.mrb[0].mxu1  ;;  %v697_v9 = vrot.slane %v688_v3, %v1675_v20 }
 0x25a   :  { %v559_v16 = vadd.f32 %v558_v14, %v484_v8  ;;  %v629_v17 = vpop.f32.mrb[1].mxu1  ;;  %v628_v21 = vadd.f32 %v627_v15, %v484_v8 }
 0x25b   :  { %v630_v23 = vadd.f32 %v629_v17, %v484_v8 }
 0x25c   :  { %v632_v18 = vadd.f32 %v559_v16, %v557_v10 }
 0x25e   :  { %v633_v22 = vadd.f32 %v632_v18, %v628_v21 }
 0x260   :  { %v634_v24 = vadd.f32 %v633_v22, %v630_v23 }
 0x262   :  { %635 = vadd.xlane.f32.xlu0 %v634_v24  ;;  %v693_v24 = vrot.slane %v688_v3, %v1678_v25 }
 0x2ef   :  { %v636_v26 = vpop.xlane.xlu0 %635 }
 0x2f0   :  { %v637_v27 = vmul.f32 0.001953125, %v636_v26  ;;  %v735_v26 = vrot.slane %v730_v4, %v1678_v25 }
 0x2f2   :  { %v638_v28 = vsub.f32 %v557_v10, %v637_v27  ;;  %v639_v29 = vsub.f32 %v559_v16, %v637_v27  ;;  %v640_v32 = vsub.f32 %v628_v21, %v637_v27  ;;  %v641_v33 = vsub.f32 %v630_v23, %v637_v27 }
 0x2f3   :  { %v739_v10 = vrot.slane %v730_v4, %v1675_v20 }
 0x2f4   :  { %v642_v13 = vmul.f32 %v638_v28, %v638_v28  ;;  %v643_v34 = vmul.f32 %v639_v29, %v639_v29  ;;  %v644_v35 = vmul.f32 %v640_v32, %v640_v32  ;;  %v645_v37 = vmul.f32 %v641_v33, %v641_v33 }
 0x2f6   :  { %v646_v36 = vadd.f32 %v643_v34, %v642_v13 }
 0x2f8   :  { %v647_v38 = vadd.f32 %v646_v36, %v644_v35  ;;  %v743_v35 = vrot.slane %v730_v4, %v1685_v30  ;;  %v747_v36 = vrot.slane %v730_v4, %v1687_v31 }
 0x2fa   :  { %v648_v39 = vadd.f32 %v647_v38, %v645_v37 }
 0x2fc   :  { %649 = vadd.xlane.f32.xlu1 %v648_v39 }
 0x30d   :  { %665 = vperm.xlu1 %1368, %v1594_v1  }
 0x389   :  { %v650_v42 = vpop.xlane.xlu1 %649 }
 0x38a   :  { %v651_v44 = vmul.f32 0.001953125, %v650_v42 }
 0x38c   :  { %v652_v45 = vadd.f32 1e-05, %v651_v44 }
 0x38d   :  { %v666_v49 = vpop.permute.xlu1 %665 }
 0x38e   :  { %1372 = vrsqrt.f32 %v652_v45 }
 0x398   :  { %v1373_v46 = vpop.eup %1372 }
 0x399   :  { %v654_v47 = vmul.f32 %v1373_v46, %v1594_v1 }
 0x39b   :  { %657 = vperm.xlu0 %1367, %v654_v47  }
 0x39f   :  { %1369 = vset.pattern.permute.xlu0 %v1517_v61 }
 0x41a   :  { %v658_v48 = vpop.permute.xlu0 %657 }
 0x41b   :  { %v660_v50 = vmul.f32 %v658_v48, %v638_v28  ;;  %v661_v51 = vmul.f32 %v658_v48, %v639_v29  ;;  %v662_v52 = vmul.f32 %v658_v48, %v640_v32  ;;  %v663_v53 = vmul.f32 %v658_v48, %v641_v33 }
 0x41c   :  { %v701_v29 = vrot.slane %v688_v3, %v1685_v30  ;;  %v705_v32 = vrot.slane %v688_v3, %v1687_v31 }
 0x41d   :  { %v668_v43 = vadd.f32 %v666_v49, %v660_v50  ;;  %v670_v54 = vadd.f32 %v666_v49, %v662_v52  ;;  %v669_v55 = vadd.f32 %v666_v49, %v661_v51  ;;  %v671_v59 = vadd.f32 %v666_v49, %v663_v53  ;;  %v814_v49 = vld [vmem:[#allocation9 + $0x3] ss:$8 sm:$0xf] }
 0x41e   :  { %v823_v53 = vrot.slane %v814_v49, %v1675_v20  ;;  %v819_v4 = vrot.slane %v814_v49, %v1678_v25 }
 0x41f   :  { %v1797_v56 = vmax.f32 %v668_v43, 0.0  ;;  %v1799_v57 = vmax.f32 %v670_v54, 0.0  ;;  %v1805_v58 = vmax.f32 %v669_v55, 0.0  ;;  %v1815_v60 = vmax.f32 %v671_v59, 0.0 }
 0x420   :  { %v772_v43 = vld [vmem:[#allocation9 + $0x2] ss:$8 sm:$0xf] }
 0x421   :  { %680 = vrot.lane.b32.xlu0 %v1799_v57, %s1506_s12  ;;  %676 = vrot.lane.b32.xlu1 %v1797_v56, %s1506_s12  ;;  %v781_v55 = vrot.slane %v772_v43, %v1675_v20 }
 0x425   :  { %760 = vrot.lane.b32.xlu0 %v1797_v56, %s1507_s13  ;;  %678 = vrot.lane.b32.xlu1 %v1805_v58, %s1506_s12 }
 0x429   :  { %802 = vrot.lane.b32.xlu0 %v1797_v56, %s1508_s1  ;;  %718 = vrot.lane.b32.xlu1 %v1797_v56, %s1505_s3 }
 0x42d   :  { %766 = vrot.lane.b32.xlu0 %v1815_v60, %s1507_s13  ;;  %720 = vrot.lane.b32.xlu1 %v1805_v58, %s1505_s3 }
 0x431   :  { %764 = vrot.lane.b32.xlu0 %v1799_v57, %s1507_s13  ;;  %682 = vrot.lane.b32.xlu1 %v1815_v60, %s1506_s12 }
 0x435   :  { %850 = vrot.lane.b32.xlu0 %v1805_v58, %s1509_s14  ;;  %724 = vrot.lane.b32.xlu1 %v1815_v60, %s1505_s3 }
 0x439   :  { %848 = vrot.lane.b32.xlu0 %v1797_v56, %s1509_s14  ;;  %722 = vrot.lane.b32.xlu1 %v1799_v57, %s1505_s3 }
 0x43d   :  { %892 = vrot.lane.b32.xlu0 %v1805_v58, %s1510_s15  ;;  %762 = vrot.lane.b32.xlu1 %v1805_v58, %s1507_s13 }
 0x441   :  { %934 = vrot.lane.b32.xlu0 %v1805_v58, %s1511_s16  ;;  %804 = vrot.lane.b32.xlu1 %v1805_v58, %s1508_s1 }
 0x445   :  { %890 = vrot.lane.b32.xlu0 %v1797_v56, %s1510_s15  ;;  %808 = vrot.lane.b32.xlu1 %v1815_v60, %s1508_s1 }
 0x449   :  { %896 = vrot.lane.b32.xlu0 %v1815_v60, %s1510_s15  ;;  %806 = vrot.lane.b32.xlu1 %v1799_v57, %s1508_s1 }
 0x44d   :  { %976 = vrot.lane.b32.xlu0 %v1805_v58, %s1512_s17  ;;  %852 = vrot.lane.b32.xlu1 %v1799_v57, %s1509_s14 }
 0x451   :  { %974 = vrot.lane.b32.xlu0 %v1797_v56, %s1512_s17  ;;  %854 = vrot.lane.b32.xlu1 %v1815_v60, %s1509_s14 }
 0x455   :  { %894 = vrot.lane.b32.xlu1 %v1799_v57, %s1510_s15  ;;  %1053 = vperm.xlu0 %1369, %v1594_v1  }
 0x459   :  { %936 = vrot.lane.b32.xlu1 %v1799_v57, %s1511_s16 }
 0x45d   :  { %932 = vrot.lane.b32.xlu1 %v1797_v56, %s1511_s16 }
 0x461   :  { %938 = vrot.lane.b32.xlu1 %v1815_v60, %s1511_s16 }
 0x465   :  { %978 = vrot.lane.b32.xlu1 %v1799_v57, %s1512_s17 }
 0x469   :  { %980 = vrot.lane.b32.xlu1 %v1815_v60, %s1512_s17 }
 0x493   :  { %v681_v62 = vpop.permute.xlu0 %680  ;;  %v677_v63 = vpop.permute.xlu1 %676 }
 0x497   :  { %v761_v0 = vpop.permute.xlu0 %760  ;;  %v679_v2 = vpop.permute.xlu1 %678 }
 0x498   :  { %v686_v1 = vsel %vm99_vm0, %v677_v63, %v679_v2  ;;  %v685_v37 = vsel %vm99_vm0, %v679_v2, %v681_v62 }
 0x499   :  { %v711_v17 = vmul.f32 %v697_v9, %v686_v1  ;;  %v712_v45 = vmul.f32 %v701_v29, %v685_v37 }
 0x49b   :  { %v803_v5 = vpop.permute.xlu0 %802  ;;  %v719_v8 = vpop.permute.xlu1 %718 }
 0x49f   :  { %v767_v14 = vpop.permute.xlu0 %766  ;;  %v721_v15 = vpop.permute.xlu1 %720 }
 0x4a0   :  { %v728_v16 = vsel %vm142_vm1, %v719_v8, %v721_v15 }
 0x4a1   :  { %v753_v18 = vmul.f32 %v739_v10, %v728_v16  ;;  %v860_v16 = vld [vmem:[#allocation9 + $0x5] ss:$8 sm:$0xf] }
 0x4a3   :  { %v683_v21 = vpop.permute.xlu1 %682  ;;  %v1306_v22 = vpack.c.bf16 %v753_v18, %v711_v17  ;;  %v765_v23 = vpop.permute.xlu0 %764  ;;  %v785_v17 = vrot.slane %v772_v43, %v1685_v30 }
 0x4a4   :  { %v687_v27 = vsel %vm99_vm0, %v683_v21, %v677_v63  ;;  %v684_v38 = vsel %vm99_vm0, %v681_v62, %v683_v21  ;;  %v777_v63 = vrot.slane %v772_v43, %v1678_v25  ;;  %v827_v21 = vrot.slane %v814_v49, %v1685_v30 }
 0x4a5   :  { %1307 = vmatprep.subr.bf16.mxu0 %v1306_v22  ;;  %v710_v13 = vmul.f32 %v693_v24, %v687_v27  ;;  %v713_v46 = vmul.f32 %v705_v32, %v684_v38  ;;  %v768_v24 = vsel %vm186_vm2, %v765_v23, %v767_v14 }
 0x4a7   :  { %v725_v28 = vpop.permute.xlu1 %724  ;;  %v851_v39 = vpop.permute.xlu0 %850 }
 0x4a8   :  { %v729_v33 = vsel %vm142_vm1, %v725_v28, %v719_v8  ;;  %v771_v8 = vsel %vm186_vm2, %v767_v14, %v761_v0  ;;  %v869_v14 = vrot.slane %v860_v16, %v1675_v20 }
 0x4a9   :  { %v752_v34 = vmul.f32 %v735_v26, %v729_v33  ;;  %v794_v22 = vmul.f32 %v777_v63, %v771_v8  ;;  %v902_v63 = vld [vmem:[#allocation9 + $0x6] ss:$8 sm:$0xf] }
 0x4ab   :  { %v1308_v40 = vpack.c.bf16 %v752_v34, %v710_v13  ;;  %v723_v41 = vpop.permute.xlu1 %722  ;;  %v849_v54 = vpop.permute.xlu0 %848 }
 0x4ac   :  { %v726_v42 = vsel %vm142_vm1, %v723_v41, %v725_v28  ;;  %v727_v44 = vsel %vm142_vm1, %v721_v15, %v723_v41  ;;  %v789_v15 = vrot.slane %v772_v43, %v1687_v31  ;;  %v865_v28 = vrot.slane %v860_v16, %v1678_v25 }
 0x4ad   :  { %v754_v47 = vmul.f32 %v743_v35, %v727_v44  ;;  %v755_v48 = vmul.f32 %v747_v36, %v726_v42  ;;  %1309 = vmatpush1.bf16.msra.mxu0 %v1308_v40  ;;  %v858_v35 = vsel %vm278_vm4, %v849_v54, %v851_v39 }
 0x4ae   :  { %v797_v33 = vmul.f32 %v789_v15, %v768_v24  ;;  %v882_v42 = vmul.f32 %v865_v28, %v858_v35 }
 0x4af   :  { %v1324_v50 = vpack.c.bf16 %v754_v47, %v712_v45  ;;  %v763_v51 = vpop.permute.xlu1 %762  ;;  %v1322_v52 = vpack.c.bf16 %v755_v48, %v713_v46  ;;  %v1904_v9 = vpop.permute.xlu0 %892  ;;  %v873_v46 = vrot.slane %v860_v16, %v1685_v30  ;;  %v877_v47 = vrot.slane %v860_v16, %v1687_v31 }
 0x4b0   :  { %v770_v59 = vsel %vm186_vm2, %v761_v0, %v763_v51  ;;  %v831_v0 = vrot.slane %v814_v49, %v1687_v31  ;;  %v769_v27 = vsel %vm186_vm2, %v763_v51, %v765_v23  ;;  %v1316_v51 = vpack.c.bf16 %v882_v42, %v1797_v56 }
 0x4b1   :  { %1323 = vmatprep.subr.bf16.mxu1 %v1322_v52  ;;  %v795_v2 = vmul.f32 %v781_v55, %v770_v59  ;;  %v796_v36 = vmul.f32 %v785_v17, %v769_v27  ;;  %v911_v56 = vrot.slane %v902_v63, %v1675_v20 }
 0x4b2   :  { %1325 = vmatpush1.bf16.msra.mxu1 %v1324_v50 }
 0x4b3   :  { %v805_v61 = vpop.permute.xlu1 %804  ;;  %v935_v13 = vpop.permute.xlu0 %934 }
 0x4b4   :  { %v812_v62 = vsel %vm230_vm3, %v803_v5, %v805_v61 }
 0x4b5   :  { %v837_v3 = vmul.f32 %v823_v53, %v812_v62  ;;  %v944_v53 = vld [vmem:[#allocation9 + $0x7] ss:$8 sm:$0xf] }
 0x4b6   :  { %v961_v27 = vrot.slane %v944_v53, %v1687_v31 }
 0x4b7   :  { %v809_v10 = vpop.permute.xlu1 %808  ;;  %v1310_v1 = vpack.c.bf16 %v837_v3, %v795_v2  ;;  %v891_v48 = vpop.permute.xlu0 %890  ;;  %v953_v2 = vrot.slane %v944_v53, %v1675_v20 }
 0x4b8   :  { %v813_v18 = vsel %vm230_vm3, %v809_v10, %v803_v5 }
 0x4b9   :  { %v836_v26 = vmul.f32 %v819_v4, %v813_v18  ;;  %1311 = vmatprep.subr.bf16.mxu0 %v1310_v1  ;;  %v900_v1 = vsel %vm322_vm5, %v891_v48, %v1904_v9  ;;  %v919_v18 = vrot.slane %v902_v63, %v1687_v31 }
 0x4bb   :  { %v1312_v29 = vpack.c.bf16 %v836_v26, %v794_v22  ;;  %v807_v32 = vpop.permute.xlu1 %806 }
 0x4bc   :  { %v810_v5 = vsel %vm230_vm3, %v807_v32, %v809_v10  ;;  %v811_v34 = vsel %vm230_vm3, %v805_v61, %v807_v32  ;;  %v949_v10 = vrot.slane %v944_v53, %v1678_v25 }
 0x4bd   :  { %v838_v37 = vmul.f32 %v827_v21, %v811_v34  ;;  %v839_v23 = vmul.f32 %v831_v0, %v810_v5  ;;  %1313 = vmatpush1.bf16.msra.mxu0 %v1312_v29  ;;  %v915_v21 = vrot.slane %v902_v63, %v1685_v30  ;;  %v957_v0 = vrot.slane %v944_v53, %v1685_v30  ;;  %v986_v29 = vld [vmem:[#allocation9 + $0x20] ss:$8 sm:$0xf] }
 0x4bf   :  { %v1328_v38 = vpack.c.bf16 %v838_v37, %v796_v36  ;;  %v853_v40 = vpop.permute.xlu1 %852  ;;  %v1326_v41 = vpack.c.bf16 %v839_v23, %v797_v33 }
 0x4c0   :  { %v857_v44 = vsel %vm278_vm4, %v851_v39, %v853_v40 }
 0x4c1   :  { %v883_v45 = vmul.f32 %v869_v14, %v857_v44  ;;  %1327 = vmatprep.subr.bf16.mxu1 %v1326_v41  ;;  %v995_v14 = vrot.slane %v986_v29, %v1675_v20  ;;  %v999_v20 = vrot.slane %v986_v29, %v1685_v30 }
 0x4c2   :  { %1329 = vmatpush1.bf16.msra.mxu1 %v1328_v38  ;;  %v991_v38 = vrot.slane %v986_v29, %v1678_v25 }
 0x4c3   :  { %v855_v49 = vpop.permute.xlu1 %854  ;;  %v1314_v50 = vpack.c.bf16 %v883_v45, %v1805_v58  ;;  %v897_v58 = vpop.permute.xlu0 %896 }
 0x4c4   :  { %v856_v52 = vsel %vm278_vm4, %v853_v40, %v855_v49  ;;  %v859_v43 = vsel %vm278_vm4, %v855_v49, %v849_v54  ;;  %v71_v49 = vld [vmem:[#allocation6 + $0x8] sm:$0xff] }
 0x4c5   :  { %v884_v39 = vmul.f32 %v873_v46, %v856_v52  ;;  %v885_v55 = vmul.f32 %v877_v47, %v859_v43  ;;  %1315 = vmatprep.subr.bf16.mxu0 %v1314_v50  ;;  %v1003_v47 = vrot.slane %v986_v29, %v1687_v31 }
 0x4c6   :  { %1317 = vmatpush1.bf16.msra.mxu0 %v1316_v51 }
 0x4c7   :  { %v1332_v59 = vpack.c.bf16 %v884_v39, %v1799_v57  ;;  %v895_v61 = vpop.permute.xlu1 %894  ;;  %v1330_v62 = vpack.c.bf16 %v885_v55, %v1815_v60  ;;  %v907_v57 = vrot.slane %v902_v63, %v1678_v25  ;;  %v977_v15 = vpop.permute.xlu0 %976 }
 0x4c8   :  { %v899_v54 = vsel %vm322_vm5, %v1904_v9, %v895_v61  ;;  %v901_v9 = vsel %vm322_vm5, %v897_v58, %v891_v48  ;;  %v898_v28 = vsel %vm322_vm5, %v895_v61, %v897_v58 }
 0x4c9   :  { %1331 = vmatprep.subr.bf16.mxu1 %v1330_v62  ;;  %v925_v8 = vmul.f32 %v911_v56, %v899_v54  ;;  %v924_v24 = vmul.f32 %v907_v57, %v900_v1  ;;  %v927_v35 = vmul.f32 %v919_v18, %v901_v9  ;;  %v926_v36 = vmul.f32 %v915_v21, %v898_v28 }
 0x4ca   :  { %1333 = vmatpush1.bf16.msra.mxu1 %v1332_v59  ;;  %v1518_v21 = vmov 6  }
 0x4cb   :  { %v937_v3 = vpop.permute.xlu1 %936  ;;  %v975_v5 = vpop.permute.xlu0 %974  ;;  %1370 = vset.pattern.permute.xlu1 %v1518_v21 }
 0x4cc   :  { %v941_v4 = vsel %vm366_vm6, %v935_v13, %v937_v3  ;;  %v984_v40 = vsel %vm410_vm7, %v975_v5, %v977_v15 }
 0x4cd   :  { %v967_v60 = vmul.f32 %v953_v2, %v941_v4  ;;  %v1008_v48 = vmul.f32 %v991_v38, %v984_v40 }
 0x4cf   :  { %v933_v16 = vpop.permute.xlu1 %932  ;;  %v1318_v17 = vpack.c.bf16 %v967_v60, %v925_v8 }
 0x4d0   :  { %v942_v22 = vsel %vm366_vm6, %v933_v16, %v935_v13 }
 0x4d1   :  { %v966_v26 = vmul.f32 %v949_v10, %v942_v22  ;;  %1319 = vmatprep.subr.bf16.mxu0 %v1318_v17  ;;  %v1519_v22 = vmov 7  }
 0x4d2   :  { %1371 = vset.pattern.permute.xlu0 %v1519_v22 }
 0x4d3   :  { %v1320_v32 = vpack.c.bf16 %v966_v26, %v924_v24  ;;  %v939_v33 = vpop.permute.xlu1 %938  ;;  %v1376_v24 = vld [vmem:[#allocation8] sm:$0xff] }
 0x4d4   :  { %v940_v13 = vsel %vm366_vm6, %v937_v3, %v939_v33  ;;  %v943_v34 = vsel %vm366_vm6, %v939_v33, %v933_v16  ;;  %v1054_v30 = vpop.permute.xlu0 %1053 }
 0x4d5   :  { %v968_v37 = vmul.f32 %v957_v0, %v940_v13  ;;  %v969_v23 = vmul.f32 %v961_v27, %v943_v34  ;;  %1321 = vmatpush1.bf16.msra.mxu0 %v1320_v32 }
 0x4d7   :  { %v1336_v41 = vpack.c.bf16 %v968_v37, %v926_v36  ;;  %v979_v42 = vpop.permute.xlu1 %978  ;;  %v1334_v44 = vpack.c.bf16 %v969_v23, %v927_v35 }
 0x4d8   :  { %v983_v45 = vsel %vm410_vm7, %v977_v15, %v979_v42 }
 0x4d9   :  { %v1009_v46 = vmul.f32 %v995_v14, %v983_v45  ;;  %1335 = vmatprep.subr.bf16.mxu1 %v1334_v44 }
 0x4da   :  { %1337 = vmatpush1.bf16.msra.mxu1 %v1336_v41 }
 0x4db   :  { %1075 = vmatprep.subr.mxu0 %v1009_v46  ;;  %v981_v25 = vpop.permute.xlu1 %980 }
 0x4dc   :  { %v982_v50 = vsel %vm410_vm7, %v979_v42, %v981_v25  ;;  %v985_v51 = vsel %vm410_vm7, %v981_v25, %v975_v5  ;;  %1076 = vmatpush1.msra.mxu0 %v1008_v48 }
 0x4dd   :  { %v1010_v52 = vmul.f32 %v999_v20, %v982_v50  ;;  %v1011_v43 = vmul.f32 %v1003_v47, %v985_v51  ;;  %1272 = vmatmul.mubr.msk.f32.vlgmr.msra.gmra.mrb[2].mxu0 %vm486_vm8, %v71_v49 }
 0x4df   :  { %1146 = vmatprep.subr.mxu1 %v1011_v43 }
 0x4e0   :  { %1147 = vmatpush1.msra.mxu1 %v1010_v52 }
 0x4e1   :  { %1273 = vmatmul.mubr.msk.f32.vlgmr.msra.gmra.mrb[2].mxu1 %vm486_vm8, %v71_v49 }
 0x5b0   :  { %v1125_v31 = vpop.f32.mrb[2].mxu0 }
 0x5b1   :  { %v1126_v39 = vadd.f32 %v1125_v31, %v1054_v30  ;;  %v1127_v55 = vpop.f32.mrb[3].mxu0 }
 0x5b2   :  { %v1128_v53 = vadd.f32 %v1127_v55, %v1054_v30 }
 0x5b4   :  { %v1201_v59 = vadd.f32 %v1128_v53, %v1126_v39  ;;  %v1196_v61 = vpop.f32.mrb[2].mxu1 }
 0x5b5   :  { %v1197_v62 = vadd.f32 %v1196_v61, %v1054_v30  ;;  %v1198_v63 = vpop.f32.mrb[3].mxu1 }
 0x5b6   :  { %v1199_v19 = vadd.f32 %v1198_v63, %v1054_v30 }
 0x5b7   :  { %v1202_v58 = vadd.f32 %v1201_v59, %v1197_v62 }
 0x5b9   :  { %v1203_v56 = vadd.f32 %v1202_v58, %v1199_v19 }
 0x5bb   :  { %1204 = vadd.xlane.f32.xlu1 %v1203_v56 }
 0x648   :  { %v1205_v2 = vpop.xlane.xlu1 %1204 }
 0x649   :  { %v1206_v54 = vmul.f32 0.001953125, %v1205_v2 }
 0x64b   :  { %v1207_v3 = vsub.f32 %v1126_v39, %v1206_v54  ;;  %v1208_v4 = vsub.f32 %v1128_v53, %v1206_v54  ;;  %v1209_v57 = vsub.f32 %v1197_v62, %v1206_v54  ;;  %v1210_v8 = vsub.f32 %v1199_v19, %v1206_v54 }
 0x64d   :  { %v1211_v60 = vmul.f32 %v1207_v3, %v1207_v3  ;;  %v1212_v10 = vmul.f32 %v1208_v4, %v1208_v4  ;;  %v1213_v1 = vmul.f32 %v1209_v57, %v1209_v57  ;;  %v1214_v16 = vmul.f32 %v1210_v8, %v1210_v8 }
 0x64f   :  { %v1215_v15 = vadd.f32 %v1212_v10, %v1211_v60 }
 0x651   :  { %v1216_v17 = vadd.f32 %v1215_v15, %v1213_v1 }
 0x653   :  { %v1217_v18 = vadd.f32 %v1216_v17, %v1214_v16 }
 0x655   :  { %1218 = vadd.xlane.f32.xlu0 %v1217_v18 }
 0x66b   :  { %1234 = vperm.xlu0 %1371, %v1376_v24  }
 0x6e2   :  { %v1219_v26 = vpop.xlane.xlu0 %1218 }
 0x6e3   :  { %v1220_v0 = vmul.f32 0.001953125, %v1219_v26 }
 0x6e5   :  { %v1221_v27 = vadd.f32 1e-05, %v1220_v0 }
 0x6e7   :  { %1374 = vrsqrt.f32 %v1221_v27 }
 0x6ea   :  { %v1235_v32 = vpop.permute.xlu0 %1234 }
 0x6f1   :  { %v1375_v9 = vpop.eup %1374 }
 0x6f2   :  { %v1223_v28 = vmul.f32 %v1376_v24, %v1375_v9 }
 0x6f4   :  { %1226 = vperm.xlu1 %1370, %v1223_v28  }
 0x773   :  { %v1227_v29 = vpop.permute.xlu1 %1226 }
 0x774   :  { %v1229_v33 = vmul.f32 %v1227_v29, %v1207_v3  ;;  %v1230_v5 = vmul.f32 %v1227_v29, %v1208_v4  ;;  %v1231_v13 = vmul.f32 %v1227_v29, %v1209_v57  ;;  %v1232_v34 = vmul.f32 %v1227_v29, %v1210_v8 }
 0x776   :  { %v1237_v14 = vadd.f32 %v1235_v32, %v1229_v33  ;;  %v1238_v35 = vadd.f32 %v1235_v32, %v1230_v5  ;;  %v1239_v36 = vadd.f32 %v1235_v32, %v1231_v13  ;;  %v1240_v37 = vadd.f32 %v1235_v32, %v1232_v34 }
 0x778   :  { %v1241_v23 = vmax.f32 %v1237_v14, 0.0  ;;  %v1242_v38 = vmax.f32 %v1238_v35, 0.0  ;;  %v1243_v40 = vmax.f32 %v1239_v36, 0.0  ;;  %v1244_v41 = vmax.f32 %v1240_v37, 0.0 }
 0x77a   :  { %v1245_v42 = vadd.f32 %v1241_v23, %v1598_v6  ;;  %v1246_v44 = vadd.f32 %v1242_v38, %v1600_v7  ;;  %v1247_v45 = vadd.f32 %v1243_v40, %v1610_v12  ;;  %v1248_v46 = vadd.f32 %v1244_v41, %v1606_v11 }
 0x77c   :  { %1249 = vst [vmem:[#allocation11] sm:$0xff] %v1245_v42  ;;  %1250 = vst [vmem:[#allocation11 + $0x8] sm:$0xff] %v1246_v44 }
 0x77d   :  { %1251 = vst [vmem:[#allocation11 + $0x10] sm:$0xff] %v1247_v45  ;;  %1252 = vst [vmem:[#allocation11 + $0x18] sm:$0xff] %v1248_v46 }
 0x77e   :  { %1476 = shalt.err (!%p1473_p8)
}
 0x77f   :  { %s1477_s23 = scalar_lea.hbm %s1996_s4, 512 }
 0x780   :  { %p1478_p9 = scmp.ne.s32.totalorder %s1996_s4, %s1477_s23  ;;  %p1481_p10 = scmp.lt.u32.totalorder %s1477_s23, %s1996_s4 }
 0x782   :  { %p1483_p11 = pnand %p1481_p10, %p1478_p9 }
 0x784   :  { %1486 = shalt.err (!%p1483_p11)
}
 0x785   :  { %1262 = dma.vmem_to_hbm [thread:$0]  %s1260_s19, 512, %s1996_s4, [#allocation5]  }
 0x786   :  { %1493 = dma.done.wait [#allocation5], 512  }
 0x787   :  { %1494 = vsyncadd [#allocation5], 4294966784 }
 0x788   :  { %1266 = vsyncpa [#allocation4], 1 }
 0x789   :  { %1267 = vsyncpa [#allocation7], 1 }
 0x78a   :  { %1268 = vsyncpa [#allocation10], 1 }
 0x78b   :  { %1269 = vsyncpa [#allocation5], 1 }

</bundles_post_ra>
